<compile_context>
chip_gen: v5e
topology: v5e:2x2
jax: 0.10.0
libtpu: 0.0.40
codegen_flags: <defaults>
</compile_context>

<pallas_src>
import functools
import math

import jax
import jax.numpy as jnp
from jax import lax
from jax.experimental import pallas as pl
from jax.experimental.pallas import tpu as pltpu

_NEG_INF = -1e30  # finite sentinel keeps exp()/max() NaN-free on masked lanes


def _angular_margin_kernel(logits_ref, labels_ref, loss_ref,
                           m_sc, l_sc, t_sc, *,
                           cos_m, sin_m, th, mm, scale,
                           num_classes, block_c, mask_classes):
    k = pl.program_id(1)

    @pl.when(k == 0)
    def _():
        m_sc[...] = jnp.full_like(m_sc, _NEG_INF)
        l_sc[...] = jnp.zeros_like(l_sc)
        t_sc[...] = jnp.zeros_like(t_sc)

    # clamp(-1, 1) in f32 (bf16 inputs widened in-vreg)
    x = jnp.clip(logits_ref[...].astype(jnp.float32), -1.0, 1.0)   # (TB, TC)
    labels = labels_ref[...]                                       # (TB, 1) i32

    col = lax.broadcasted_iota(jnp.int32, x.shape, 1) + k * block_c
    is_target = col == labels                                      # (TB, TC) bool

    # running (clamped) target logit — exactly one hit across all class tiles
    t_sc[...] += jnp.sum(jnp.where(is_target, x, 0.0), axis=-1, keepdims=True)

    # streaming logsumexp over scaled non-target (and in-range) classes
    keep = jnp.logical_not(is_target)
    if mask_classes:
        keep = jnp.logical_and(keep, col < num_classes)
    z = jnp.where(keep, x * scale, _NEG_INF)

    m_prev = m_sc[...]
    m_new = jnp.maximum(m_prev, jnp.max(z, axis=-1, keepdims=True))
    l_sc[...] = (jnp.exp(m_prev - m_new) * l_sc[...]
                 + jnp.sum(jnp.exp(z - m_new), axis=-1, keepdims=True))
    m_sc[...] = m_new

    @pl.when(k == pl.num_programs(1) - 1)
    def _():
        # per-row ArcFace margin math runs once, not per class tile
        t = t_sc[...]                                              # (TB, 1)
        sin_t = jnp.sqrt(jnp.maximum(1.0 - t * t, 0.0))
        cos_tm = t * cos_m - sin_t * sin_m
        cos_tm = jnp.where(t - th <= 0.0, t - mm, cos_tm)
        z_t = cos_tm * scale           # = output[row, label]; also the CE target term
        m_fin = jnp.maximum(m_sc[...], z_t)
        l_fin = l_sc[...] * jnp.exp(m_sc[...] - m_fin) + jnp.exp(z_t - m_fin)
        loss_ref[...] = m_fin + jnp.log(l_fin) - z_t               # per-row CE loss


def angular_margin_loss(logits, labels, margin=0.5, scale=30.0,
                        block_b=128, block_c=2048):
    """logits: (B, C) cosine similarities (f32 or bf16); labels: (B,) int class ids."""
    B, C = logits.shape

    # batch tile: sublane-aligned multiple of 8 (or the full batch when small)
    tb = B if B <= block_b else max((block_b // 8) * 8, 8)
    # class tile: lane-dense multiple of 128 (or the full class dim when small)
    tc = C if C <= block_c else max((block_c // 128) * 128, 128)

    grid = (pl.cdiv(B, tb), pl.cdiv(C, tc))
    mask_classes = (C % tc) != 0        # only ragged class tiles need column masking

    labels2 = labels.astype(jnp.int32).reshape(B, 1)

    kernel = functools.partial(
        _angular_margin_kernel,
        cos_m=math.cos(margin), sin_m=math.sin(margin),
        th=math.cos(math.pi - margin), mm=math.sin(math.pi - margin) * margin,
        scale=scale, num_classes=C, block_c=tc, mask_classes=mask_classes,
    )

    per_row = pl.pallas_call(
        kernel,
        out_shape=jax.ShapeDtypeStruct((B, 1), jnp.float32),
        grid_spec=pltpu.PrefetchScalarGridSpec(
            num_scalar_prefetch=0,
            grid=grid,                                             # (batch, class) tiles
            in_specs=[
                pl.BlockSpec((tb, tc), lambda i, k: (i, k)),       # logits stream
                pl.BlockSpec((tb, 1), lambda i, k: (i, 0)),        # labels, resident per row tile
            ],
            out_specs=pl.BlockSpec((tb, 1), lambda i, k: (i, 0)),
            scratch_shapes=[pltpu.VMEM((tb, 1), jnp.float32),      # running max  m
                            pltpu.VMEM((tb, 1), jnp.float32),      # running sum  l
                            pltpu.VMEM((tb, 1), jnp.float32)],     # target logit t
        ),
        compiler_params=pltpu.CompilerParams(
            dimension_semantics=("parallel", "arbitrary")),
    )(logits, labels2)

    # batch mean over the real rows (ragged boundary rows never reach the output)
    return jnp.sum(per_row[:, 0]) / B


def _reference_loss(logits, labels, margin=0.5, scale=30.0):
    """Pure-JAX mirror of the PyTorch AngularMarginLoss forward."""
    B, C = logits.shape
    cos_m, sin_m = math.cos(margin), math.sin(margin)
    th = math.cos(math.pi - margin)
    mm = math.sin(math.pi - margin) * margin
    ct = jnp.clip(logits.astype(jnp.float32), -1.0, 1.0)
    t = ct[jnp.arange(B), labels][:, None]
    ctm = t * cos_m - jnp.sqrt(1.0 - t * t) * sin_m
    ctm = jnp.where(t - th <= 0.0, t - mm, ctm)
    one_hot = jax.nn.one_hot(labels, C, dtype=jnp.float32)
    out = (ct * (1.0 - one_hot) + ctm * one_hot) * scale
    return jnp.mean(jax.nn.logsumexp(out, axis=-1) - out[jnp.arange(B), labels])


if __name__ == "__main__":
    key = jax.random.PRNGKey(0)

    # (B, C, block_b, block_c): single-tile case + a ragged multi-tile streaming case
    cases = [
        (8, 16, 128, 2048),   # one block, class dim smaller than a lane tile
        (13, 300, 8, 128),    # ragged batch + ragged class tiles, streaming reduction
    ]
    for idx, (B, C, bb, bc) in enumerate(cases):
        k1, k2 = jax.random.split(jax.random.fold_in(key, idx))
        logits = jnp.tanh(jax.random.normal(k1, (B, C), dtype=jnp.float32))  # cosine-like
        labels = jax.random.randint(k2, (B,), 0, C, dtype=jnp.int32)

        loss = angular_margin_loss(logits, labels, margin=0.5, scale=30.0,
                                   block_b=bb, block_c=bc)
        jax.block_until_ready(loss)
        ref = _reference_loss(logits, labels, margin=0.5, scale=30.0)

        assert loss.shape == () and bool(jnp.isfinite(loss)), (B, C, loss)
        assert bool(jnp.allclose(loss, ref, rtol=1e-5, atol=1e-5)), (B, C, loss, ref)

    print("KERNEL_OK")
</pallas_src>

<mosaic_0001>
module attributes {stable_mosaic.version = 11 : i64} {
  func.func @_angular_margin_kernel(%arg0: i32, %arg1: i32, %arg2: memref<8x16xf32, #tpu.memory_space<vmem>>, %arg3: memref<8x1xi32, #tpu.memory_space<vmem>>, %arg4: memref<8x1xf32, #tpu.memory_space<vmem>>, %arg5: memref<8x1xf32, #tpu.memory_space<vmem>>, %arg6: memref<8x1xf32, #tpu.memory_space<vmem>>, %arg7: memref<8x1xf32, #tpu.memory_space<vmem>>) attributes {dimension_semantics = [#tpu.dimension_semantics<parallel>, #tpu.dimension_semantics<arbitrary>], iteration_bounds = array<i64: 1, 1>, scalar_prefetch = 0 : i64, scratch_operands = 3 : i64, tpu.core_type = #tpu.core_type<tc>, window_params = [{transform_indices = @transform_0, window_bounds = array<i64: 8, 16>}, {transform_indices = @transform_1, window_bounds = array<i64: 8, 1>}, {transform_indices = @transform_2, window_bounds = array<i64: 8, 1>}]} {
    %c0_i32 = arith.constant 0 : i32
    %0 = arith.cmpi eq, %arg1, %c0_i32 : i32
    %1 = arith.extui %0 : i1 to i32
    %c0_i32_0 = arith.constant 0 : i32
    %2 = arith.cmpi ne, %1, %c0_i32_0 : i32
    scf.if %2 {
      %cst_26 = arith.constant -1.000000e+30 : f32
      %46 = vector.broadcast %cst_26 : f32 to vector<8x1xf32>
      %c0_27 = arith.constant 0 : index
      %c0_28 = arith.constant 0 : index
      %47 = vector.load %arg5[%c0_27, %c0_28] : memref<8x1xf32, #tpu.memory_space<vmem>>, vector<8x1xf32>
      tpu.vector_store %arg5[%c0_27, %c0_28], %46 {strides = array<i32>} : memref<8x1xf32, #tpu.memory_space<vmem>>, vector<8x1xf32>,
      %cst_29 = arith.constant 0.000000e+00 : f32
      %48 = vector.broadcast %cst_29 : f32 to vector<8x1xf32>
      %c0_30 = arith.constant 0 : index
      %c0_31 = arith.constant 0 : index
      %49 = vector.load %arg6[%c0_30, %c0_31] : memref<8x1xf32, #tpu.memory_space<vmem>>, vector<8x1xf32>
      tpu.vector_store %arg6[%c0_30, %c0_31], %48 {strides = array<i32>} : memref<8x1xf32, #tpu.memory_space<vmem>>, vector<8x1xf32>,
      %cst_32 = arith.constant 0.000000e+00 : f32
      %50 = vector.broadcast %cst_32 : f32 to vector<8x1xf32>
      %c0_33 = arith.constant 0 : index
      %c0_34 = arith.constant 0 : index
      %51 = vector.load %arg7[%c0_33, %c0_34] : memref<8x1xf32, #tpu.memory_space<vmem>>, vector<8x1xf32>
      tpu.vector_store %arg7[%c0_33, %c0_34], %50 {strides = array<i32>} : memref<8x1xf32, #tpu.memory_space<vmem>>, vector<8x1xf32>,
    } else {
    }
    %c0 = arith.constant 0 : index
    %c0_1 = arith.constant 0 : index
    %3 = vector.load %arg2[%c0, %c0_1] : memref<8x16xf32, #tpu.memory_space<vmem>>, vector<8x16xf32>
    %cst = arith.constant -1.000000e+00 : f32
    %cst_2 = arith.constant 1.000000e+00 : f32
    %4 = vector.broadcast %cst : f32 to vector<8x16xf32>
    %5 = arith.maximumf %4, %3 : vector<8x16xf32>
    %6 = vector.broadcast %cst_2 : f32 to vector<8x16xf32>
    %7 = arith.minimumf %6, %5 : vector<8x16xf32>
    %c0_3 = arith.constant 0 : index
    %c0_4 = arith.constant 0 : index
    %8 = vector.load %arg3[%c0_3, %c0_4] : memref<8x1xi32, #tpu.memory_space<vmem>>, vector<8x1xi32>
    %9 = tpu.iota {dimensions = array<i32: 1>} : vector<8x16xi32>
    %c16_i32 = arith.constant 16 : i32
    %10 = arith.muli %arg1, %c16_i32 : i32
    %11 = vector.broadcast %10 : i32 to vector<8x16xi32>
    %12 = arith.addi %9, %11 : vector<8x16xi32>
    %13 = vector.broadcast %8 : vector<8x1xi32> to vector<8x16xi32>
    %14 = arith.cmpi eq, %12, %13 : vector<8x16xi32>
    %c0_5 = arith.constant 0 : index
    %c0_6 = arith.constant 0 : index
    %15 = vector.load %arg7[%c0_5, %c0_6] : memref<8x1xf32, #tpu.memory_space<vmem>>, vector<8x1xf32>
    %cst_7 = arith.constant 0.000000e+00 : f32
    %16 = vector.broadcast %cst_7 : f32 to vector<8x16xf32>
    %17 = arith.select %14, %7, %16 : vector<8x16xi1>, vector<8x16xf32>
    %cst_8 = arith.constant dense<0.000000e+00> : vector<8xf32>
    %18 = vector.multi_reduction <add>, %17, %cst_8 [1] : vector<8x16xf32> to vector<8xf32>
    %19 = vector.shape_cast %18 : vector<8xf32> to vector<8x1xf32>
    %20 = arith.addf %15, %19 : vector<8x1xf32>
    %c0_9 = arith.constant 0 : index
    %c0_10 = arith.constant 0 : index
    %21 = vector.load %arg7[%c0_9, %c0_10] : memref<8x1xf32, #tpu.memory_space<vmem>>, vector<8x1xf32>
    tpu.vector_store %arg7[%c0_9, %c0_10], %20 {strides = array<i32>} : memref<8x1xf32, #tpu.memory_space<vmem>>, vector<8x1xf32>,
    %cst_11 = arith.constant dense<true> : vector<8x16xi1>
    %22 = arith.xori %14, %cst_11 : vector<8x16xi1>
    %cst_12 = arith.constant 3.000000e+01 : f32
    %23 = vector.broadcast %cst_12 : f32 to vector<8x16xf32>
    %24 = arith.mulf %7, %23 : vector<8x16xf32>
    %cst_13 = arith.constant -1.000000e+30 : f32
    %25 = vector.broadcast %cst_13 : f32 to vector<8x16xf32>
    %26 = arith.select %22, %24, %25 : vector<8x16xi1>, vector<8x16xf32>
    %c0_14 = arith.constant 0 : index
    %c0_15 = arith.constant 0 : index
    %27 = vector.load %arg5[%c0_14, %c0_15] : memref<8x1xf32, #tpu.memory_space<vmem>>, vector<8x1xf32>
    %cst_16 = arith.constant dense<0xFF800000> : vector<8xf32>
    %28 = vector.multi_reduction <maximumf>, %26, %cst_16 [1] : vector<8x16xf32> to vector<8xf32>
    %29 = vector.shape_cast %28 : vector<8xf32> to vector<8x1xf32>
    %30 = arith.maximumf %27, %29 : vector<8x1xf32>
    %31 = arith.subf %27, %30 : vector<8x1xf32>
    %32 = math.exp %31 : vector<8x1xf32>
    %c0_17 = arith.constant 0 : index
    %c0_18 = arith.constant 0 : index
    %33 = vector.load %arg6[%c0_17, %c0_18] : memref<8x1xf32, #tpu.memory_space<vmem>>, vector<8x1xf32>
    %34 = arith.mulf %32, %33 : vector<8x1xf32>
    %35 = vector.broadcast %30 : vector<8x1xf32> to vector<8x16xf32>
    %36 = arith.subf %26, %35 : vector<8x16xf32>
    %37 = math.exp %36 : vector<8x16xf32>
    %cst_19 = arith.constant dense<0.000000e+00> : vector<8xf32>
    %38 = vector.multi_reduction <add>, %37, %cst_19 [1] : vector<8x16xf32> to vector<8xf32>
    %39 = vector.shape_cast %38 : vector<8xf32> to vector<8x1xf32>
    %40 = arith.addf %34, %39 : vector<8x1xf32>
    %c0_20 = arith.constant 0 : index
    %c0_21 = arith.constant 0 : index
    %41 = vector.load %arg6[%c0_20, %c0_21] : memref<8x1xf32, #tpu.memory_space<vmem>>, vector<8x1xf32>
    tpu.vector_store %arg6[%c0_20, %c0_21], %40 {strides = array<i32>} : memref<8x1xf32, #tpu.memory_space<vmem>>, vector<8x1xf32>,
    %c0_22 = arith.constant 0 : index
    %c0_23 = arith.constant 0 : index
    %42 = vector.load %arg5[%c0_22, %c0_23] : memref<8x1xf32, #tpu.memory_space<vmem>>, vector<8x1xf32>
    tpu.vector_store %arg5[%c0_22, %c0_23], %30 {strides = array<i32>} : memref<8x1xf32, #tpu.memory_space<vmem>>, vector<8x1xf32>,
    %c0_i32_24 = arith.constant 0 : i32
    %43 = arith.cmpi eq, %arg1, %c0_i32_24 : i32
    %44 = arith.extui %43 : i1 to i32
    %c0_i32_25 = arith.constant 0 : i32
    %45 = arith.cmpi ne, %44, %c0_i32_25 : i32
    scf.if %45 {
      %c0_26 = arith.constant 0 : index
      %c0_27 = arith.constant 0 : index
      %46 = vector.load %arg7[%c0_26, %c0_27] : memref<8x1xf32, #tpu.memory_space<vmem>>, vector<8x1xf32>
      %47 = arith.mulf %46, %46 : vector<8x1xf32>
      %cst_28 = arith.constant 1.000000e+00 : f32
      %48 = vector.broadcast %cst_28 : f32 to vector<8x1xf32>
      %49 = arith.subf %48, %47 : vector<8x1xf32>
      %cst_29 = arith.constant 0.000000e+00 : f32
      %50 = vector.broadcast %cst_29 : f32 to vector<8x1xf32>
      %51 = arith.maximumf %49, %50 : vector<8x1xf32>
      %52 = math.sqrt %51 : vector<8x1xf32>
      %cst_30 = arith.constant 0.87758255 : f32
      %53 = vector.broadcast %cst_30 : f32 to vector<8x1xf32>
      %54 = arith.mulf %46, %53 : vector<8x1xf32>
      %cst_31 = arith.constant 0.47942555 : f32
      %55 = vector.broadcast %cst_31 : f32 to vector<8x1xf32>
      %56 = arith.mulf %52, %55 : vector<8x1xf32>
      %57 = arith.subf %54, %56 : vector<8x1xf32>
      %cst_32 = arith.constant -0.87758255 : f32
      %58 = vector.broadcast %cst_32 : f32 to vector<8x1xf32>
      %59 = arith.subf %46, %58 : vector<8x1xf32>
      %cst_33 = arith.constant 0.000000e+00 : f32
      %60 = vector.broadcast %cst_33 : f32 to vector<8x1xf32>
      %61 = arith.cmpf ole, %59, %60 : vector<8x1xf32>
      %cst_34 = arith.constant 0.239712775 : f32
      %62 = vector.broadcast %cst_34 : f32 to vector<8x1xf32>
      %63 = arith.subf %46, %62 : vector<8x1xf32>
      %64 = arith.select %61, %63, %57 : vector<8x1xi1>, vector<8x1xf32>
      %cst_35 = arith.constant 3.000000e+01 : f32
      %65 = vector.broadcast %cst_35 : f32 to vector<8x1xf32>
      %66 = arith.mulf %64, %65 : vector<8x1xf32>
      %c0_36 = arith.constant 0 : index
      %c0_37 = arith.constant 0 : index
      %67 = vector.load %arg5[%c0_36, %c0_37] : memref<8x1xf32, #tpu.memory_space<vmem>>, vector<8x1xf32>
      %68 = arith.maximumf %67, %66 : vector<8x1xf32>
      %c0_38 = arith.constant 0 : index
      %c0_39 = arith.constant 0 : index
      %69 = vector.load %arg6[%c0_38, %c0_39] : memref<8x1xf32, #tpu.memory_space<vmem>>, vector<8x1xf32>
      %c0_40 = arith.constant 0 : index
      %c0_41 = arith.constant 0 : index
      %70 = vector.load %arg5[%c0_40, %c0_41] : memref<8x1xf32, #tpu.memory_space<vmem>>, vector<8x1xf32>
      %71 = arith.subf %70, %68 : vector<8x1xf32>
      %72 = math.exp %71 : vector<8x1xf32>
      %73 = arith.mulf %69, %72 : vector<8x1xf32>
      %74 = arith.subf %66, %68 : vector<8x1xf32>
      %75 = math.exp %74 : vector<8x1xf32>
      %76 = arith.addf %73, %75 : vector<8x1xf32>
      %77 = math.log %76 : vector<8x1xf32>
      %78 = arith.addf %68, %77 : vector<8x1xf32>
      %79 = arith.subf %78, %66 : vector<8x1xf32>
      %c0_42 = arith.constant 0 : index
      %c0_43 = arith.constant 0 : index
      %80 = vector.load %arg4[%c0_42, %c0_43] : memref<8x1xf32, #tpu.memory_space<vmem>>, vector<8x1xf32>
      tpu.vector_store %arg4[%c0_42, %c0_43], %79 {strides = array<i32>} : memref<8x1xf32, #tpu.memory_space<vmem>>, vector<8x1xf32>,
    } else {
    }
    return
  }
  func.func @transform_0(%arg0: i32, %arg1: i32) -> (i32, i32) {
    %c0_i32 = arith.constant 0 : i32
    return %arg0, %arg1 : i32, i32
  }
  func.func @transform_1(%arg0: i32, %arg1: i32) -> (i32, i32) {
    %c0_i32 = arith.constant 0 : i32
    %c0_i32_0 = arith.constant 0 : i32
    return %arg0, %c0_i32 : i32, i32
  }
  func.func @transform_2(%arg0: i32, %arg1: i32) -> (i32, i32) {
    %c0_i32 = arith.constant 0 : i32
    %c0_i32_0 = arith.constant 0 : i32
    return %arg0, %c0_i32 : i32, i32
  }
}

</mosaic_0001>

<bundles_post_ra>
// kernel: tpu_custom_call.1
= control target key start
LH: loop header
LB: loop body
LE: loop exit
PB: predicated region body
PF: predicated region fallthrough
CT: control target
= control target key end

     0   :  { %v136_v0 = vmov 0   ;;  %vm15_vm0 = vcmask 7168   ;;  %v137_v2 = vmov -1e+30   ;;  %v23_v4 = vlaneseq  ;;  %s174_s1 = inlined_call_operand.vmem [shape: s32[8,1], index: 1, kind: input, shape index: {}]   ;;  %s175_s0 = inlined_call_operand.vmem [shape: f32[8,16], index: 0, kind: input, shape index: {}]   ;;  %s176_s2 = inlined_call_operand.vmem [shape: f32[8,1], index: 2, kind: output, shape index: {}]  }
   0x1   :  { %122 = vset.pattern.permute.xlu0 %v136_v0  ;;  %v22_v1 = vld [vmem:[%s174_s1] sm:$0xff]  ;;  %123 = vset.pattern.permute.xlu1 %v136_v0  ;;  %16 = vst.msk [vmem:[#allocation2] sm:$0xff] %vm15_vm0, %v137_v2  ;;  %vm34_vm2 = vcmask 130048   ;;  %vm138_vm3 = vmmov 1   ;;  %v139_v12 = vmov 0.0  }
   0x2   :  { %29 = vperm.xlu0 %122, %v22_v1   ;;  %v19_v3 = vld [vmem:[%s175_s0] sm:$0xff]  ;;  %v24_v6 = vand.u32 127, %v23_v4  ;;  %18 = vst.msk [vmem:[#allocation4] sm:$0xff] %vm15_vm0, %v139_v12 }
   0x3   :  { %v115_v5 = vclamps-f32 %v19_v3, 1.0  ;;  %17 = vst.msk [vmem:[#allocation3] sm:$0xff] %vm15_vm0, %v139_v12 }
   0x5   :  { %v42_v7 = vmul.f32 30.0, %v115_v5 }
   0x8   :  { %v44_v13 = vld [vmem:[#allocation2] sm:$0xff] }
   0x9   :  { %v32_v23 = vld [vmem:[#allocation4] sm:$0xff] }
   0xa   :  { %v52_v51 = vld [vmem:[#allocation3] sm:$0xff] }
  0x74   :  { %v30_v8 = vpop.permute.xlu0 %29 }
  0x75   :  { %vm31_vm1 = vcmp.eq.s32.totalorder %v24_v6, %v30_v8 }
  0x76   :  { %vm41_vm4 = vmxor %vm31_vm1, %vm138_vm3  ;;  %v33_v9 = vsel %vm31_vm1, %v115_v5, 0.0 }
  0x77   :  { %v43_v10 = vsel %vm41_vm4, %v42_v7, -1e+30  ;;  %v35_v17 = vsel %vm34_vm2, %v33_v9, 0.0 }
  0x78   :  { %v45_v11 = vsel %vm34_vm2, %v43_v10, -inf }
  0x79   :  { %46 = vmax.xlane.f32.xlu0 %v45_v11 }
  0xec   :  { %v47_v14 = vpop.xlane.xlu0 %46 }
  0xed   :  { %v48_v15 = vmax.f32 %v44_v13, %v47_v14 }
  0xef   :  { %v49_v16 = vsub.f32 %v44_v13, %v48_v15  ;;  %67 = vst.msk [vmem:[#allocation2] sm:$0xff] %vm15_vm0, %v48_v15  ;;  %56 = vperm.xlu1 %123, %v48_v15  }
  0xf1   :  { %v50_v46 = vmul.f32 1.442695, %v49_v16 }
  0xf6   :  { %v95_v48 = vld [vmem:[#allocation2] sm:$0xff] }
 0x119   :  { %36 = vadd.xlane.f32.xlu1 %v35_v17 }
 0x161   :  { %v57_v18 = vpop.permute.xlu1 %56 }
 0x162   :  { %v59_v19 = vsub.f32 %v43_v10, %v57_v18 }
 0x164   :  { %v60_v20 = vmul.f32 1.442695, %v59_v19 }
 0x166   :  { %124 = vpow2.f32 %v60_v20 }
 0x16c   :  { %v125_v21 = vpop.eup %124 }
 0x16d   :  { %v62_v22 = vsel %vm34_vm2, %v125_v21, 0.0 }
 0x16e   :  { %63 = vadd.xlane.f32.xlu2 %v62_v22 }
 0x18c   :  { %v37_v24 = vpop.xlane.xlu1 %36 }
 0x18d   :  { %v38_v25 = vadd.f32 %v37_v24, %v32_v23 }
 0x18f   :  { %40 = vst.msk [vmem:[#allocation4] sm:$0xff] %vm15_vm0, %v38_v25 }
 0x196   :  { %v71_v26 = vld [vmem:[#allocation4] sm:$0xff] }
 0x197   :  { %v72_v27 = vmul.f32 %v71_v26, %v71_v26  ;;  %v87_v41 = vmul.f32 0.87758255, %v71_v26  ;;  %v116_v42 = vadd.f32 0.87758255, %v71_v26  ;;  %v117_v44 = vadd.f32 -0.23971277, %v71_v26 }
 0x199   :  { %v73_v28 = vsub.f32 1.0, %v72_v27  ;;  %vm91_vm7 = vcmp.le.f32.partialorder %v116_v42, 0.0 }
 0x19b   :  { %v74_v29 = vmax.f32 %v73_v28, 0.0 }
 0x19d   :  { %126 = vrsqrt.f32 %v74_v29  ;;  %vm82_vm5 = vcmp.eq.f32.partialorder %v74_v29, inf  ;;  %v85_v38 = vand.u32 2147483648, %v74_v29  ;;  %vm84_vm6 = vcmp.eq.f32.partialorder %v74_v29, 0.0 }
 0x19e   :  { %128 = vpow2.f32 %v50_v46 }
 0x1a3   :  { %v127_v30 = vpop.eup %126 }
 0x1a4   :  { %v76_v31 = vmul.f32 %v127_v30, %v74_v29  ;;  %v129_v50 = vpop.eup %128 }
 0x1a5   :  { %v53_v54 = vmul.f32 %v129_v50, %v52_v51 }
 0x1a6   :  { %v77_v32 = vmul.f32 %v127_v30, %v76_v31 }
 0x1a8   :  { %v78_v33 = vmul.f32 0.5, %v77_v32 }
 0x1aa   :  { %v79_v34 = vsub.f32 1.5, %v78_v33 }
 0x1ac   :  { %v80_v35 = vmul.f32 %v127_v30, %v79_v34 }
 0x1ae   :  { %v81_v36 = vmul.f32 %v80_v35, %v74_v29 }
 0x1b0   :  { %v83_v37 = vsel %vm82_vm5, %v74_v29, %v81_v36 }
 0x1b1   :  { %v86_v39 = vsel %vm84_vm6, %v85_v38, %v83_v37 }
 0x1b2   :  { %v88_v40 = vmul.f32 0.47942555, %v86_v39 }
 0x1b4   :  { %v89_v43 = vsub.f32 %v87_v41, %v88_v40 }
 0x1b6   :  { %v93_v45 = vsel %vm91_vm7, %v117_v44, %v89_v43 }
 0x1b7   :  { %v94_v47 = vmul.f32 30.0, %v93_v45 }
 0x1b9   :  { %v96_v49 = vmax.f32 %v95_v48, %v94_v47 }
 0x1bb   :  { %v98_v52 = vsub.f32 %v95_v48, %v96_v49  ;;  %v102_v53 = vsub.f32 %v94_v47, %v96_v49 }
 0x1bd   :  { %v99_v56 = vmul.f32 1.442695, %v98_v52  ;;  %v103_v58 = vmul.f32 1.442695, %v102_v53 }
 0x1bf   :  { %130 = vpow2.f32 %v99_v56 }
 0x1c0   :  { %132 = vpow2.f32 %v103_v58 }
 0x1c5   :  { %v131_v59 = vpop.eup %130 }
 0x1c6   :  { %v133_v62 = vpop.eup %132 }
 0x1e1   :  { %v64_v55 = vpop.xlane.xlu2 %63 }
 0x1e2   :  { %v65_v57 = vadd.f32 %v64_v55, %v53_v54 }
 0x1e4   :  { %66 = vst.msk [vmem:[#allocation3] sm:$0xff] %vm15_vm0, %v65_v57 }
 0x1eb   :  { %v97_v60 = vld [vmem:[#allocation3] sm:$0xff] }
 0x1ec   :  { %v101_v61 = vmul.f32 %v131_v59, %v97_v60 }
 0x1ee   :  { %v105_v63 = vadd.f32 %v133_v62, %v101_v61 }
 0x1f0   :  { %134 = vlog2.f32 %v105_v63 }
 0x1f6   :  { %v135_v0 = vpop.eup %134 }
 0x1f7   :  { %v107_v1 = vmul.f32 0.6931472, %v135_v0 }
 0x1f9   :  { %v108_v2 = vadd.f32 %v107_v1, %v96_v49 }
 0x1fb   :  { %v109_v3 = vsub.f32 %v108_v2, %v94_v47 }
 0x1fd   :  { %110 = vst.msk [vmem:[%s176_s2] sm:$0xff] %vm15_vm0, %v109_v3 }

</bundles_post_ra>
